<compile_context>
chip_gen: v6e
topology: v6e:2x2x1
jax: 0.10.0
libtpu: 0.0.40
codegen_flags: <defaults>
</compile_context>

<pallas_src>
import jax
import jax.numpy as jnp
from jax.experimental import pallas as pl
from jax.experimental.pallas import tpu as pltpu

# ---------------- sizes (match the module default input_dim=5, small b/N) ----
B = 4    # batch
N = 16   # number of elements attended over
D = 5    # input_dim (SelfAttnEncoder default)


# ------------------------------- kernel --------------------------------------
def self_attn_kernel(x_ref, w_ref, b_ref, out_ref):
    # x_ref: (B, N, D)   w_ref: (1, 1, D)   b_ref: (1, 1, 1)   out_ref: (B, D)
    x = x_ref[...].astype(jnp.float32)
    w = w_ref[...].astype(jnp.float32)       # broadcast over (B, N)
    bias = b_ref[...].astype(jnp.float32)    # broadcast over (B, N)

    # score_func: Linear(D -> 1) applied per (b, n)  ->  (B, N, 1)
    s = jnp.sum(x * w, axis=-1, keepdims=True) + bias

    # softmax over N (dim=1), numerically stable
    m = jnp.max(s, axis=1, keepdims=True)          # (B, 1, 1)
    e = jnp.exp(s - m)                             # (B, N, 1)
    p = e / jnp.sum(e, axis=1, keepdims=True)      # (B, N, 1)

    # context = sum_n p[b, n] * x[b, n, :]
    ctx = jnp.sum(p * x, axis=1)                   # (B, D)
    out_ref[...] = ctx.astype(out_ref.dtype)


# ------------------------------- wrapper --------------------------------------
@jax.jit
def self_attn_encoder_pallas(inp, w_score, b_score):
    b, n, d = inp.shape
    # nn.Linear(d, 1): weight (1, d), bias (1,) — reshape wrapper-side so the
    # kernel only broadcasts (no in-kernel reshapes).
    w3 = w_score.reshape(1, 1, d).astype(jnp.float32)
    b3 = b_score.reshape(1, 1, 1).astype(jnp.float32)

    grid_spec = pltpu.PrefetchScalarGridSpec(
        num_scalar_prefetch=0,
        grid=(1,),                                  # single invocation
        in_specs=[
            pl.BlockSpec((b, n, d), lambda i: (0, 0, 0)),   # full array
            pl.BlockSpec((1, 1, d), lambda i: (0, 0, 0)),
            pl.BlockSpec((1, 1, 1), lambda i: (0, 0, 0)),
        ],
        out_specs=pl.BlockSpec((b, d), lambda i: (0, 0)),
    )

    return pl.pallas_call(
        self_attn_kernel,
        grid_spec=grid_spec,
        out_shape=jax.ShapeDtypeStruct((b, d), jnp.float32),
        compiler_params=pltpu.CompilerParams(
            dimension_semantics=("arbitrary",)),
    )(inp.astype(jnp.float32), w3, b3)


# --------------------------- pure-JAX reference --------------------------------
def self_attn_encoder_ref(inp, w_score, b_score):
    scores = jnp.einsum("bnd,d->bn", inp, w_score.reshape(-1)) + b_score.reshape(())
    p = jax.nn.softmax(scores, axis=1)
    return jnp.sum(p[:, :, None] * inp, axis=1)


# --------------------------------- main ----------------------------------------
if __name__ == "__main__":
    key = jax.random.PRNGKey(0)
    k1, k2, k3 = jax.random.split(key, 3)

    inp = jax.random.normal(k1, (B, N, D), dtype=jnp.float32)
    # score_func = nn.Linear(input_dim, 1): weight (1, D), bias (1,)
    w_score = (0.3 * jax.random.normal(k2, (1, D))).astype(jnp.float32)
    b_score = (0.1 * jax.random.normal(k3, (1,))).astype(jnp.float32)

    context = self_attn_encoder_pallas(inp, w_score, b_score)
    context = jax.block_until_ready(context)

    ref = self_attn_encoder_ref(inp, w_score, b_score)
    assert context.shape == (B, D)
    assert jnp.allclose(context, ref, rtol=1e-4, atol=1e-4), "mismatch vs reference"

    # TODO(synk): forward_full's optional output_mlp (num_output_mlp > 0, relies on
    # an externally-defined Mlp class) is not implemented; the default
    # construction (num_output_mlp=0) returns only the attention context.
    print("KERNEL_OK")
</pallas_src>

<mosaic_0001>
module attributes {stable_mosaic.version = 11 : i64} {
  func.func @self_attn_kernel(%arg0: i32, %arg1: memref<4x16x5xf32, #tpu.memory_space<vmem>>, %arg2: memref<1x1x5xf32, #tpu.memory_space<vmem>>, %arg3: memref<1x1x1xf32, #tpu.memory_space<vmem>>, %arg4: memref<4x5xf32, #tpu.memory_space<vmem>>) attributes {dimension_semantics = [#tpu.dimension_semantics<arbitrary>], iteration_bounds = array<i64: 1>, scalar_prefetch = 0 : i64, scratch_operands = 0 : i64, tpu.core_type = #tpu.core_type<tc>, window_params = [{pipeline_mode = #tpu.pipeline_mode<synchronous>, transform_indices = @transform_0, window_bounds = array<i64: 4, 16, 5>}, {pipeline_mode = #tpu.pipeline_mode<synchronous>, transform_indices = @transform_1, window_bounds = array<i64: 1, 1, 5>}, {pipeline_mode = #tpu.pipeline_mode<synchronous>, transform_indices = @transform_2, window_bounds = array<i64: 1, 1, 1>}, {pipeline_mode = #tpu.pipeline_mode<synchronous>, transform_indices = @transform_3, window_bounds = array<i64: 4, 5>}]} {
    %c0 = arith.constant 0 : index
    %c0_0 = arith.constant 0 : index
    %c0_1 = arith.constant 0 : index
    %0 = vector.load %arg1[%c0, %c0_0, %c0_1] : memref<4x16x5xf32, #tpu.memory_space<vmem>>, vector<4x16x5xf32>
    %c0_2 = arith.constant 0 : index
    %c0_3 = arith.constant 0 : index
    %c0_4 = arith.constant 0 : index
    %1 = vector.load %arg2[%c0_2, %c0_3, %c0_4] : memref<1x1x5xf32, #tpu.memory_space<vmem>>, vector<1x1x5xf32>
    %c0_5 = arith.constant 0 : index
    %c0_6 = arith.constant 0 : index
    %c0_7 = arith.constant 0 : index
    %2 = vector.load %arg3[%c0_5, %c0_6, %c0_7] : memref<1x1x1xf32, #tpu.memory_space<vmem>>, vector<1x1x1xf32>
    %3 = vector.broadcast %1 : vector<1x1x5xf32> to vector<4x16x5xf32>
    %4 = arith.mulf %0, %3 : vector<4x16x5xf32>
    %cst = arith.constant dense<0.000000e+00> : vector<4x16xf32>
    %5 = vector.multi_reduction <add>, %4, %cst [2] : vector<4x16x5xf32> to vector<4x16xf32>
    %6 = vector.shape_cast %5 : vector<4x16xf32> to vector<4x16x1xf32>
    %7 = vector.broadcast %2 : vector<1x1x1xf32> to vector<4x16x1xf32>
    %8 = arith.addf %6, %7 : vector<4x16x1xf32>
    %cst_8 = arith.constant dense<0xFF800000> : vector<4x1xf32>
    %9 = vector.multi_reduction <maximumf>, %8, %cst_8 [1] : vector<4x16x1xf32> to vector<4x1xf32>
    %10 = vector.shape_cast %9 : vector<4x1xf32> to vector<4x1x1xf32>
    %11 = vector.broadcast %10 : vector<4x1x1xf32> to vector<4x16x1xf32>
    %12 = arith.subf %8, %11 : vector<4x16x1xf32>
    %13 = math.exp %12 : vector<4x16x1xf32>
    %cst_9 = arith.constant dense<0.000000e+00> : vector<4x1xf32>
    %14 = vector.multi_reduction <add>, %13, %cst_9 [1] : vector<4x16x1xf32> to vector<4x1xf32>
    %15 = vector.shape_cast %14 : vector<4x1xf32> to vector<4x1x1xf32>
    %16 = vector.broadcast %15 : vector<4x1x1xf32> to vector<4x16x1xf32>
    %17 = arith.divf %13, %16 : vector<4x16x1xf32>
    %18 = vector.broadcast %17 : vector<4x16x1xf32> to vector<4x16x5xf32>
    %19 = arith.mulf %18, %0 : vector<4x16x5xf32>
    %cst_10 = arith.constant dense<0.000000e+00> : vector<4x5xf32>
    %20 = vector.multi_reduction <add>, %19, %cst_10 [1] : vector<4x16x5xf32> to vector<4x5xf32>
    %c0_11 = arith.constant 0 : index
    %c0_12 = arith.constant 0 : index
    %21 = vector.load %arg4[%c0_11, %c0_12] : memref<4x5xf32, #tpu.memory_space<vmem>>, vector<4x5xf32>
    tpu.vector_store %arg4[%c0_11, %c0_12], %20 {strides = array<i32>} : memref<4x5xf32, #tpu.memory_space<vmem>>, vector<4x5xf32>,
    return
  }
  func.func @transform_0(%arg0: i32) -> (i32, i32, i32) {
    %c0_i32 = arith.constant 0 : i32
    %c0_i32_0 = arith.constant 0 : i32
    %c0_i32_1 = arith.constant 0 : i32
    %c0_i32_2 = arith.constant 0 : i32
    return %c0_i32, %c0_i32_0, %c0_i32_1 : i32, i32, i32
  }
  func.func @transform_1(%arg0: i32) -> (i32, i32, i32) {
    %c0_i32 = arith.constant 0 : i32
    %c0_i32_0 = arith.constant 0 : i32
    %c0_i32_1 = arith.constant 0 : i32
    %c0_i32_2 = arith.constant 0 : i32
    return %c0_i32, %c0_i32_0, %c0_i32_1 : i32, i32, i32
  }
  func.func @transform_2(%arg0: i32) -> (i32, i32, i32) {
    %c0_i32 = arith.constant 0 : i32
    %c0_i32_0 = arith.constant 0 : i32
    %c0_i32_1 = arith.constant 0 : i32
    %c0_i32_2 = arith.constant 0 : i32
    return %c0_i32, %c0_i32_0, %c0_i32_1 : i32, i32, i32
  }
  func.func @transform_3(%arg0: i32) -> (i32, i32) {
    %c0_i32 = arith.constant 0 : i32
    %c0_i32_0 = arith.constant 0 : i32
    %c0_i32_1 = arith.constant 0 : i32
    return %c0_i32, %c0_i32_0 : i32, i32
  }
}

</mosaic_0001>

<bundles_post_ra>
// kernel: self_attn_encoder_pallas.1
= control target key start
LH: loop header
LB: loop body
LE: loop exit
PB: predicated region body
PF: predicated region fallthrough
CT: control target
= control target key end

     0   :  { %s471_s0 = inlined_call_operand.vmem [shape: f32[4,16,5], index: 0, kind: input, shape index: {}]   ;;  %s472_s1 = inlined_call_operand.vmem [shape: f32[1,1,5], index: 1, kind: input, shape index: {}]   ;;  %s473_s2 = inlined_call_operand.<no memory space> [shape: f32[1,1,1], index: 2, kind: input, shape index: {}]   ;;  %s474_s3 = inlined_call_operand.hbm [shape: f32[4,5], index: 3, kind: output, shape index: {}]  }
   0x1   :  { %v8_v0 = vstv %s473_s2 }
   0x2   :  { %9 = vst [vmem:[#allocation2] sm:$0x1] %v8_v0 }
   0x3   :  { %v380_v1 = vld [vmem:[%s471_s0 + $0x10] sm:$0xff]  ;;  %v300_v2 = vld [vmem:[%s472_s1] ss:$0 sm:$0xff]  ;;  %vm41_vm0 = vcmask 39936   ;;  %v395_v6 = vld [vmem:[%s471_s0 + $0x18] sm:$0xff] }
   0x4   :  { %v388_v3 = vld [vmem:[%s471_s0] sm:$0xff]  ;;  %v35_v4 = vmul.f32 %v300_v2, %v380_v1  ;;  %v400_v7 = vld [vmem:[%s471_s0 + $0x8] sm:$0xff]  ;;  %v36_v8 = vmul.f32 %v300_v2, %v395_v6 }
   0x5   :  { %v33_v5 = vmul.f32 %v300_v2, %v388_v3  ;;  %v34_v9 = vmul.f32 %v300_v2, %v400_v7  ;;  %v407_v10 = vld [vmem:[%s471_s0 + $0x28] sm:$0xff]  ;;  %v412_v11 = vld [vmem:[%s471_s0 + $0x20] sm:$0xff] }
   0x6   :  { %v48_v12 = vsel %vm41_vm0, %v35_v4, 0.0 }
   0x7   :  { %v42_v13 = vsel %vm41_vm0, %v33_v5, 0.0 }
   0x8   :  { %10 = vsyncpa [#allocation4], 0  ;;  %49 = vadd.xlane.f32.xlu1 %v48_v12  ;;  %43 = vadd.xlane.f32.xlu0 %v42_v13  ;;  %v51_v14 = vsel %vm41_vm0, %v36_v8, 0.0  ;;  %v45_v15 = vsel %vm41_vm0, %v34_v9, 0.0  ;;  %v38_v16 = vmul.f32 %v300_v2, %v407_v10  ;;  %v37_v17 = vmul.f32 %v300_v2, %v412_v11  ;;  %v423_v18 = vld [vmem:[%s471_s0 + $0x38] sm:$0xff]  ;;  %v428_v19 = vld [vmem:[%s471_s0 + $0x30] sm:$0xff] }
   0x9   :  { %v40_v22 = vmul.f32 %v300_v2, %v423_v18  ;;  %v39_v23 = vmul.f32 %v300_v2, %v428_v19  ;;  %v352_v26 = vmov 0   ;;  %v301_v27 = vld [vmem:[#allocation2] ss:$0 sm:$0xff]  ;;  %vm80_vm1 = vcmask 7168   ;;  %s353_s0 = smov [#allocation3]  }
   0xa   :  { %v57_v20 = vsel %vm41_vm0, %v38_v16, 0.0  ;;  %v54_v21 = vsel %vm41_vm0, %v37_v17, 0.0  ;;  %305 = vset.pattern.permute.xlu1 %v352_v26  ;;  %304 = vset.pattern.permute.xlu0 %v352_v26  ;;  %vm277_vm2 = vcmask 1041409   ;;  %vm279_vm3 = vcmask 1042434   ;;  %s292_s30 = sshll.u32 %s353_s0, 4  ;;  %s293_s30 = int_to_ptr.vmem [resolvable:$true] %s292_s30 }
   0xb   :  { %v63_v24 = vsel %vm41_vm0, %v40_v22, 0.0  ;;  %v60_v25 = vsel %vm41_vm0, %v39_v23, 0.0  ;;  %vm281_vm4 = vcmask 1043459   ;;  %vm284_vm5 = vcmask 35840   ;;  %s330_s4 = scalar_lea.vmem %s293_s30, 64  ;;  %p335_p1 = scmp.lt.s32.totalorder %s293_s30, %s293_s30 }
   0xc   :  { %52 = vadd.xlane.f32.xlu1 %v51_v14  ;;  %46 = vadd.xlane.f32.xlu0 %v45_v15  ;;  %p331_p0 = scmp.ne.s32.totalorder %s293_s30, %s330_s4  ;;  %p336_p2 = scmp.lt.s32.totalorder %s330_s4, %s330_s4 }
   0xe   :  { %p337_p3 = por %p336_p2, %p335_p1 }
  0x10   :  { %58 = vadd.xlane.f32.xlu1 %v57_v20  ;;  %55 = vadd.xlane.f32.xlu0 %v54_v21  ;;  %p338_p4 = pnand %p337_p3, %p331_p0 }
  0x14   :  { %64 = vadd.xlane.f32.xlu1 %v63_v24  ;;  %61 = vadd.xlane.f32.xlu0 %v60_v25 }
  0x91   :  { %v50_v28 = vpop.xlane.xlu1 %49  ;;  %v44_v29 = vpop.xlane.xlu0 %43 }
  0x92   :  { %v74_v30 = vadd.f32 %v301_v27, %v50_v28  ;;  %v72_v31 = vadd.f32 %v301_v27, %v44_v29 }
  0x94   :  { %v90_v34 = vsel %vm80_vm1, %v74_v30, -inf  ;;  %v81_v37 = vsel %vm80_vm1, %v72_v31, -inf }
  0x95   :  { %v53_v32 = vpop.xlane.xlu1 %52  ;;  %v47_v33 = vpop.xlane.xlu0 %46 }
  0x96   :  { %v75_v35 = vadd.f32 %v301_v27, %v53_v32  ;;  %v73_v36 = vadd.f32 %v301_v27, %v47_v33 }
  0x98   :  { %v91_v38 = vsel %vm80_vm1, %v75_v35, -inf  ;;  %v82_v39 = vsel %vm80_vm1, %v73_v36, -inf }
  0x99   :  { %v92_v40 = vmax.f32 %v90_v34, %v91_v38  ;;  %v83_v41 = vmax.f32 %v81_v37, %v82_v39  ;;  %v59_v42 = vpop.xlane.xlu1 %58  ;;  %v56_v43 = vpop.xlane.xlu0 %55 }
  0x9a   :  { %v77_v44 = vadd.f32 %v301_v27, %v59_v42  ;;  %v76_v45 = vadd.f32 %v301_v27, %v56_v43 }
  0x9b   :  { %v93_v46 = vrot.slane %v92_v40, 4  ;;  %v84_v47 = vrot.slane %v83_v41, 4 }
  0x9c   :  { %v100_v48 = vsel %vm80_vm1, %v77_v44, -inf  ;;  %v99_v49 = vsel %vm80_vm1, %v76_v45, -inf }
  0x9d   :  { %v94_v50 = vmax.f32 %v92_v40, %v93_v46  ;;  %v85_v51 = vmax.f32 %v83_v41, %v84_v47  ;;  %v101_v52 = vmax.f32 %v99_v49, %v100_v48  ;;  %v65_v53 = vpop.xlane.xlu1 %64  ;;  %v62_v54 = vpop.xlane.xlu0 %61 }
  0x9e   :  { %v79_v55 = vadd.f32 %v301_v27, %v65_v53  ;;  %v78_v56 = vadd.f32 %v301_v27, %v62_v54 }
  0x9f   :  { %v95_v57 = vrot.slane %v94_v50, 2  ;;  %v86_v58 = vrot.slane %v85_v51, 2  ;;  %v102_v59 = vrot.slane %v101_v52, 4 }
  0xa0   :  { %v109_v60 = vsel %vm80_vm1, %v79_v55, -inf  ;;  %v108_v61 = vsel %vm80_vm1, %v78_v56, -inf }
  0xa1   :  { %v96_v62 = vmax.f32 %v94_v50, %v95_v57  ;;  %v87_v63 = vmax.f32 %v85_v51, %v86_v58  ;;  %v103_v0 = vmax.f32 %v101_v52, %v102_v59  ;;  %v110_v2 = vmax.f32 %v108_v61, %v109_v60 }
  0xa3   :  { %v97_v4 = vrot.slane %v96_v62, 1  ;;  %v88_v5 = vrot.slane %v87_v63, 1  ;;  %v104_v8 = vrot.slane %v103_v0, 2  ;;  %v111_v9 = vrot.slane %v110_v2, 4 }
  0xa5   :  { %v98_v12 = vmax.f32 %v96_v62, %v97_v4  ;;  %v89_v13 = vmax.f32 %v87_v63, %v88_v5  ;;  %v105_v14 = vmax.f32 %v103_v0, %v104_v8  ;;  %v112_v15 = vmax.f32 %v110_v2, %v111_v9 }
  0xa7   :  { %v119_v16 = vsub.f32 %v74_v30, %v98_v12  ;;  %v120_v17 = vsub.f32 %v75_v35, %v98_v12  ;;  %v117_v20 = vsub.f32 %v72_v31, %v89_v13  ;;  %v118_v21 = vsub.f32 %v73_v36, %v89_v13 }
  0xa8   :  { %v106_v22 = vrot.slane %v105_v14, 1  ;;  %v113_v23 = vrot.slane %v112_v15, 2 }
  0xa9   :  { %v129_v24 = vmul.f32 1.442695, %v119_v16  ;;  %v131_v25 = vmul.f32 1.442695, %v120_v17  ;;  %v125_v26 = vmul.f32 1.442695, %v117_v20 }
  0xaa   :  { %v127_v27 = vmul.f32 1.442695, %v118_v21  ;;  %v107_v28 = vmax.f32 %v105_v14, %v106_v22  ;;  %v114_v29 = vmax.f32 %v112_v15, %v113_v23 }
  0xab   :  { %306 = vpow2.f32 %v129_v24 }
  0xac   :  { %308 = vpow2.f32 %v131_v25  ;;  %v121_v32 = vsub.f32 %v76_v45, %v107_v28  ;;  %v122_v33 = vsub.f32 %v77_v44, %v107_v28  ;;  %v115_v34 = vrot.slane %v114_v29, 1 }
  0xad   :  { %310 = vpow2.f32 %v125_v26 }
  0xae   :  { %312 = vpow2.f32 %v127_v27  ;;  %v133_v37 = vmul.f32 1.442695, %v121_v32  ;;  %v135_v30 = vmul.f32 1.442695, %v122_v33  ;;  %v116_v35 = vmax.f32 %v114_v29, %v115_v34 }
  0xb0   :  { %314 = vpow2.f32 %v133_v37  ;;  %v123_v31 = vsub.f32 %v78_v56, %v116_v35  ;;  %v124_v36 = vsub.f32 %v79_v55, %v116_v35 }
  0xb1   :  { %316 = vpow2.f32 %v135_v30 }
  0xb2   :  { %v137_v38 = vmul.f32 1.442695, %v123_v31  ;;  %v139_v39 = vmul.f32 1.442695, %v124_v36 }
  0xb4   :  { %318 = vpow2.f32 %v137_v38 }
  0xb5   :  { %320 = vpow2.f32 %v139_v39 }
  0xb8   :  { %v307_v40 = vpop.eup %306 }
  0xb9   :  { %v309_v41 = vpop.eup %308  ;;  %v150_v42 = vsel %vm80_vm1, %v307_v40, 0.0 }
  0xba   :  { %v311_v43 = vpop.eup %310  ;;  %v151_v44 = vsel %vm80_vm1, %v309_v41, 0.0 }
  0xbb   :  { %v313_v45 = vpop.eup %312  ;;  %v152_v46 = vadd.f32 %v151_v44, %v150_v42  ;;  %v141_v47 = vsel %vm80_vm1, %v311_v43, 0.0 }
  0xbc   :  { %v142_v48 = vsel %vm80_vm1, %v313_v45, 0.0 }
  0xbd   :  { %v315_v49 = vpop.eup %314  ;;  %v153_v50 = vrot.slane %v152_v46, 4  ;;  %v143_v51 = vadd.f32 %v142_v48, %v141_v47 }
  0xbe   :  { %v317_v52 = vpop.eup %316  ;;  %v159_v53 = vsel %vm80_vm1, %v315_v49, 0.0 }
  0xbf   :  { %v154_v54 = vadd.f32 %v153_v50, %v152_v46  ;;  %v144_v55 = vrot.slane %v143_v51, 4  ;;  %v160_v56 = vsel %vm80_vm1, %v317_v52, 0.0 }
  0xc0   :  { %v161_v57 = vadd.f32 %v160_v56, %v159_v53 }
  0xc1   :  { %v319_v58 = vpop.eup %318  ;;  %v145_v59 = vadd.f32 %v144_v55, %v143_v51  ;;  %v155_v60 = vrot.slane %v154_v54, 2 }
  0xc2   :  { %v321_v61 = vpop.eup %320  ;;  %v162_v62 = vrot.slane %v161_v57, 4  ;;  %v168_v63 = vsel %vm80_vm1, %v319_v58, 0.0 }
  0xc3   :  { %v169_v0 = vsel %vm80_vm1, %v321_v61, 0.0  ;;  %v146_v2 = vrot.slane %v145_v59, 2  ;;  %v156_v4 = vadd.f32 %v155_v60, %v154_v54 }
  0xc4   :  { %v163_v5 = vadd.f32 %v162_v62, %v161_v57  ;;  %v170_v8 = vadd.f32 %v169_v0, %v168_v63 }
  0xc5   :  { %v147_v9 = vadd.f32 %v146_v2, %v145_v59  ;;  %v157_v12 = vrot.slane %v156_v4, 1 }
  0xc6   :  { %v171_v13 = vrot.slane %v170_v8, 4  ;;  %v164_v14 = vrot.slane %v163_v5, 2 }
  0xc7   :  { %v148_v15 = vrot.slane %v147_v9, 1  ;;  %v158_v20 = vadd.f32 %v157_v12, %v156_v4 }
  0xc8   :  { %v172_v16 = vadd.f32 %v171_v13, %v170_v8  ;;  %v165_v21 = vadd.f32 %v164_v14, %v163_v5 }
  0xc9   :  { %v149_v17 = vadd.f32 %v148_v15, %v147_v9 }
  0xca   :  { %v166_v22 = vrot.slane %v165_v21, 1  ;;  %v173_v23 = vrot.slane %v172_v16, 2 }
  0xcb   :  { %322 = vrcp.f32 %v149_v17 }
  0xcc   :  { %324 = vrcp.f32 %v158_v20  ;;  %v167_v24 = vadd.f32 %v166_v22, %v165_v21  ;;  %v174_v25 = vadd.f32 %v173_v23, %v172_v16 }
  0xce   :  { %326 = vrcp.f32 %v167_v24  ;;  %v175_v26 = vrot.slane %v174_v25, 1 }
  0xd0   :  { %v176_v32 = vadd.f32 %v175_v26, %v174_v25 }
  0xd2   :  { %328 = vrcp.f32 %v176_v32 }
  0xd8   :  { %v323_v27 = vpop.eup %322 }
  0xd9   :  { %v179_v28 = vmul.f32 %v323_v27, %v313_v45  ;;  %v178_v29 = vmul.f32 %v323_v27, %v311_v43  ;;  %v325_v33 = vpop.eup %324 }
  0xda   :  { %v181_v34 = vmul.f32 %v325_v33, %v307_v40  ;;  %v182_v37 = vmul.f32 %v325_v33, %v309_v41 }
  0xdb   :  { %196 = vperm.xlu1 %305, %v179_v28   ;;  %191 = vperm.xlu0 %304, %v178_v29   ;;  %v327_v30 = vpop.eup %326 }
  0xdc   :  { %v184_v35 = vmul.f32 %v327_v30, %v315_v49  ;;  %v185_v31 = vmul.f32 %v327_v30, %v317_v52 }
  0xdf   :  { %201 = vperm.xlu1 %305, %v181_v34   ;;  %v329_v36 = vpop.eup %328 }
  0xe0   :  { %v187_v38 = vmul.f32 %v329_v36, %v319_v58  ;;  %v188_v39 = vmul.f32 %v329_v36, %v321_v61 }
  0xe3   :  { %206 = vperm.xlu1 %305, %v182_v37  }
  0xe7   :  { %211 = vperm.xlu1 %305, %v184_v35  }
  0xeb   :  { %216 = vperm.xlu1 %305, %v185_v31  }
  0xef   :  { %221 = vperm.xlu1 %305, %v187_v38  }
  0xf3   :  { %226 = vperm.xlu1 %305, %v188_v39  }
 0x156   :  { %v197_v42 = vpop.permute.xlu1 %196  ;;  %v192_v43 = vpop.permute.xlu0 %191 }
 0x157   :  { %v230_v45 = vmul.f32 %v197_v42, %v400_v7  ;;  %v229_v40 = vmul.f32 %v192_v43, %v388_v3 }
 0x159   :  { %v238_v48 = vsel %vm41_vm0, %v230_v45, 0.0  ;;  %v237_v49 = vsel %vm41_vm0, %v229_v40, 0.0 }
 0x15a   :  { %v202_v44 = vpop.permute.xlu1 %201  ;;  %v239_v54 = vadd.f32 %v238_v48, %v237_v49 }
 0x15b   :  { %v231_v41 = vmul.f32 %v202_v44, %v380_v1 }
 0x15c   :  { %v240_v56 = vrot.slane %v239_v54, 4 }
 0x15d   :  { %v246_v50 = vsel %vm41_vm0, %v231_v41, 0.0 }
 0x15e   :  { %v207_v46 = vpop.permute.xlu1 %206  ;;  %v241_v61 = vadd.f32 %v240_v56, %v239_v54 }
 0x15f   :  { %v232_v47 = vmul.f32 %v207_v46, %v395_v6 }
 0x160   :  { %v242_v5 = vrot.slane %v241_v61, 2 }
 0x161   :  { %v247_v51 = vsel %vm41_vm0, %v232_v47, 0.0 }
 0x162   :  { %v248_v52 = vadd.f32 %v247_v51, %v246_v50  ;;  %v212_v53 = vpop.permute.xlu1 %211  ;;  %v243_v15 = vadd.f32 %v242_v5, %v241_v61 }
 0x163   :  { %v233_v7 = vmul.f32 %v212_v53, %v412_v11 }
 0x164   :  { %v249_v55 = vrot.slane %v248_v52, 4 }
 0x165   :  { %v255_v6 = vsel %vm41_vm0, %v233_v7, 0.0 }
 0x166   :  { %v217_v3 = vpop.permute.xlu1 %216  ;;  %v250_v58 = vadd.f32 %v249_v55, %v248_v52 }
 0x167   :  { %v234_v1 = vmul.f32 %v217_v3, %v407_v10 }
 0x168   :  { %v251_v0 = vrot.slane %v250_v58, 2 }
 0x169   :  { %v256_v57 = vsel %vm41_vm0, %v234_v1, 0.0 }
 0x16a   :  { %v257_v59 = vadd.f32 %v256_v57, %v255_v6  ;;  %v222_v60 = vpop.permute.xlu1 %221  ;;  %v252_v12 = vadd.f32 %v251_v0, %v250_v58 }
 0x16b   :  { %v235_v63 = vmul.f32 %v222_v60, %v428_v19  ;;  %v244_v19 = vrot.slane %v243_v15, 1 }
 0x16c   :  { %v258_v62 = vrot.slane %v257_v59, 4  ;;  %v253_v17 = vrot.slane %v252_v12, 1 }
 0x16d   :  { %v264_v10 = vsel %vm41_vm0, %v235_v63, 0.0 }
 0x16e   :  { %v259_v2 = vadd.f32 %v258_v62, %v257_v59  ;;  %v227_v4 = vpop.permute.xlu1 %226  ;;  %v254_v23 = vadd.f32 %v253_v17, %v252_v12 }
 0x16f   :  { %v236_v11 = vmul.f32 %v227_v4, %v423_v18  ;;  %v245_v18 = vadd.f32 %v244_v19, %v243_v15 }
 0x170   :  { %v260_v8 = vrot.slane %v259_v2, 2 }
 0x171   :  { %v265_v9 = vsel %vm41_vm0, %v236_v11, 0.0  ;;  %v278_v28 = vsel %vm277_vm2, %v254_v23, %v245_v18 }
 0x172   :  { %v266_v13 = vadd.f32 %v265_v9, %v264_v10  ;;  %v261_v14 = vadd.f32 %v260_v8, %v259_v2 }
 0x174   :  { %v267_v16 = vrot.slane %v266_v13, 4  ;;  %v262_v21 = vrot.slane %v261_v14, 1 }
 0x176   :  { %v268_v20 = vadd.f32 %v267_v16, %v266_v13  ;;  %v263_v25 = vadd.f32 %v262_v21, %v261_v14 }
 0x178   :  { %v269_v22 = vrot.slane %v268_v20, 2  ;;  %v280_v29 = vsel %vm279_vm3, %v263_v25, %v278_v28 }
 0x17a   :  { %v270_v24 = vadd.f32 %v269_v22, %v268_v20 }
 0x17c   :  { %v271_v26 = vrot.slane %v270_v24, 1 }
 0x17e   :  { %v272_v27 = vadd.f32 %v271_v26, %v270_v24 }
 0x180   :  { %v282_v32 = vsel %vm281_vm4, %v272_v27, %v280_v29 }
 0x181   :  { %285 = vst.msk [vmem:[#allocation3] sm:$0xf] %vm284_vm5, %v282_v32 }
 0x182   :  { %341 = shalt.err (!%p338_p4)
}
 0x183   :  { %295 = dma.vmem_to_hbm [thread:$0]  %s293_s30, 64, %s474_s3, [#allocation4]  }
 0x184   :  { %350 = dma.done.wait [#allocation4], 64  }
 0x185   :  { %351 = vsyncadd [#allocation4], 4294967232 }
 0x186   :  { %299 = vsyncpa [#allocation4], 1 }

</bundles_post_ra>
